<compile_context>
chip_gen: v7x
topology: tpu7x:2x2x1
jax: 0.10.0
libtpu: 0.0.40
codegen_flags: <defaults>
</compile_context>

<pallas_src>
import functools

import jax
import jax.numpy as jnp
from jax import lax
from jax.experimental import pallas as pl
from jax.experimental.pallas import tpu as pltpu


def _pick(dim, tile):
    """Block size: full dim if it is small, otherwise the tile (must divide)."""
    if dim <= tile:
        return dim
    assert dim % tile == 0, f"dim {dim} must be divisible by tile {tile}"
    return tile


# ----------------------------------------------------------------------------
# Kernel 1: tiled  h = relu(x @ W1t + b1)     (W1t already [E, I])
# grid = (M/tm, I/tn, E/tk); f32 accumulator in VMEM; bf16 MXU operands.
# ----------------------------------------------------------------------------
def _linear_relu_kernel(x_ref, w_ref, b_ref, o_ref, acc_ref):
    k = pl.program_id(2)

    @pl.when(k == 0)
    def _():
        acc_ref[...] = jnp.zeros_like(acc_ref)

    acc_ref[...] += jnp.dot(x_ref[...], w_ref[...],
                            preferred_element_type=jnp.float32)

    @pl.when(k == pl.num_programs(2) - 1)
    def _():
        y = acc_ref[...] + b_ref[...].astype(jnp.float32)
        o_ref[...] = jnp.maximum(y, 0.0).astype(o_ref.dtype)


def linear_relu(x2d, w_t, bias, *, tm, tn, tk, out_dtype):
    n, kdim = x2d.shape
    out_dim = w_t.shape[1]
    bm, bn, bk = _pick(n, tm), _pick(out_dim, tn), _pick(kdim, tk)
    grid = (n // bm, out_dim // bn, kdim // bk)
    return pl.pallas_call(
        _linear_relu_kernel,
        out_shape=jax.ShapeDtypeStruct((n, out_dim), out_dtype),
        grid_spec=pltpu.PrefetchScalarGridSpec(
            num_scalar_prefetch=0,
            grid=grid,
            in_specs=[
                pl.BlockSpec((bm, bk), lambda i, j, k: (i, k)),
                pl.BlockSpec((bk, bn), lambda i, j, k: (k, j)),
                pl.BlockSpec((1, bn), lambda i, j, k: (0, j)),
            ],
            out_specs=pl.BlockSpec((bm, bn), lambda i, j, k: (i, j)),
            scratch_shapes=[pltpu.VMEM((bm, bn), jnp.float32)],
        ),
        compiler_params=pltpu.CompilerParams(
            dimension_semantics=("parallel", "parallel", "arbitrary")),
    )(x2d, w_t, bias.reshape(1, -1))


# ----------------------------------------------------------------------------
# Kernel 2: tiled  out = LayerNorm(h @ W2t + b2 + residual)   (W2t already [I, E])
# grid = (M/tm, I/tk); full E kept on the lane axis of one block so the
# LayerNorm reduction stays in-block and the output store is lane-dense.
# ----------------------------------------------------------------------------
def _linear_res_ln_kernel(h_ref, w_ref, b_ref, res_ref, g_ref, beta_ref,
                          o_ref, acc_ref, *, eps):
    k = pl.program_id(1)

    @pl.when(k == 0)
    def _():
        acc_ref[...] = jnp.zeros_like(acc_ref)

    acc_ref[...] += jnp.dot(h_ref[...], w_ref[...],
                            preferred_element_type=jnp.float32)

    @pl.when(k == pl.num_programs(1) - 1)
    def _():
        # dropout = identity (eval mode)
        y = (acc_ref[...]
             + b_ref[...].astype(jnp.float32)
             + res_ref[...].astype(jnp.float32))
        mu = jnp.mean(y, axis=-1, keepdims=True)
        var = jnp.mean(jnp.square(y - mu), axis=-1, keepdims=True)
        yhat = (y - mu) * lax.rsqrt(var + eps)     # rsqrt -> EUP slot
        out = yhat * g_ref[...].astype(jnp.float32) \
            + beta_ref[...].astype(jnp.float32)
        o_ref[...] = out.astype(o_ref.dtype)


def linear_residual_layernorm(h2d, w_t, bias, res2d, gamma, beta,
                              *, tm, tk, eps=1e-5, out_dtype=jnp.float32):
    n, kdim = h2d.shape
    e = w_t.shape[1]
    bm, bk = _pick(n, tm), _pick(kdim, tk)
    grid = (n // bm, kdim // bk)
    return pl.pallas_call(
        functools.partial(_linear_res_ln_kernel, eps=eps),
        out_shape=jax.ShapeDtypeStruct((n, e), out_dtype),
        grid_spec=pltpu.PrefetchScalarGridSpec(
            num_scalar_prefetch=0,
            grid=grid,
            in_specs=[
                pl.BlockSpec((bm, bk), lambda i, k: (i, k)),
                pl.BlockSpec((bk, e), lambda i, k: (k, 0)),
                pl.BlockSpec((1, e), lambda i, k: (0, 0)),
                pl.BlockSpec((bm, e), lambda i, k: (i, 0)),   # residual (resident over k)
                pl.BlockSpec((1, e), lambda i, k: (0, 0)),
                pl.BlockSpec((1, e), lambda i, k: (0, 0)),
            ],
            out_specs=pl.BlockSpec((bm, e), lambda i, k: (i, 0)),
            scratch_shapes=[pltpu.VMEM((bm, e), jnp.float32)],
        ),
        compiler_params=pltpu.CompilerParams(
            dimension_semantics=("parallel", "arbitrary")),
    )(h2d, w_t, bias.reshape(1, -1), res2d,
      gamma.reshape(1, -1), beta.reshape(1, -1))


# ----------------------------------------------------------------------------
# FeedForwardLayer forward
# ----------------------------------------------------------------------------
def feed_forward(params, x, *, compute_dtype=jnp.bfloat16,
                 tm=256, tn=256, tk=256):
    b, s, e = x.shape
    n = b * s
    x2d = x.reshape(n, e)

    # Weights are stored pre-transposed ([in, out]); cast MXU operands to bf16.
    w1_t = params["w1_t"].astype(compute_dtype)   # [E, I]
    w2_t = params["w2_t"].astype(compute_dtype)   # [I, E]

    h = linear_relu(x2d.astype(compute_dtype), w1_t, params["b1"],
                    tm=tm, tn=tn, tk=tk, out_dtype=compute_dtype)   # [N, I]

    out2d = linear_residual_layernorm(
        h, w2_t, params["b2"], x2d,
        params["ln_gamma"], params["ln_beta"],
        tm=tm, tk=tk, eps=1e-5, out_dtype=x.dtype)                  # [N, E]

    return out2d.reshape(b, s, e)


# ----------------------------------------------------------------------------
# Plain-JAX reference (same bf16 MXU operands / f32 accumulation)
# ----------------------------------------------------------------------------
def feed_forward_reference(params, x, compute_dtype=jnp.bfloat16):
    b, s, e = x.shape
    x2d = x.reshape(-1, e)
    w1_t = params["w1_t"].astype(compute_dtype)
    w2_t = params["w2_t"].astype(compute_dtype)
    h = jnp.dot(x2d.astype(compute_dtype), w1_t,
                preferred_element_type=jnp.float32) + params["b1"]
    h = jnp.maximum(h, 0.0).astype(compute_dtype)
    y = jnp.dot(h, w2_t, preferred_element_type=jnp.float32) + params["b2"]
    y = y + x2d
    mu = jnp.mean(y, axis=-1, keepdims=True)
    var = jnp.mean(jnp.square(y - mu), axis=-1, keepdims=True)
    yhat = (y - mu) * lax.rsqrt(var + 1e-5)
    return (yhat * params["ln_gamma"] + params["ln_beta"]).reshape(b, s, e)


# ----------------------------------------------------------------------------
# Deterministic parameter init (shapes per the module's __init__)
# ----------------------------------------------------------------------------
def init_params(key, embedding_dim, intermediate_dim):
    ks = jax.random.split(key, 4)
    s1 = 1.0 / (embedding_dim ** 0.5)
    s2 = 1.0 / (intermediate_dim ** 0.5)
    # nn.Linear stores weight as [out, in]; we pre-transpose once to [in, out].
    w1 = jax.random.uniform(ks[0], (intermediate_dim, embedding_dim),
                            minval=-s1, maxval=s1, dtype=jnp.float32)
    w2 = jax.random.uniform(ks[2], (embedding_dim, intermediate_dim),
                            minval=-s2, maxval=s2, dtype=jnp.float32)
    return {
        "w1_t": w1.T,                                                    # [E, I]
        "b1": jax.random.uniform(ks[1], (intermediate_dim,),
                                 minval=-s1, maxval=s1, dtype=jnp.float32),
        "w2_t": w2.T,                                                    # [I, E]
        "b2": jax.random.uniform(ks[3], (embedding_dim,),
                                 minval=-s2, maxval=s2, dtype=jnp.float32),
        "ln_gamma": jnp.ones((embedding_dim,), jnp.float32),
        "ln_beta": jnp.zeros((embedding_dim,), jnp.float32),
    }


if __name__ == "__main__":
    # Small shapes consistent with the module's forward contract
    # (lane-aligned feature dims; seq kept tiny).
    batch, seq, embedding_dim, intermediate_dim = 2, 8, 128, 512

    key = jax.random.PRNGKey(0)
    kp, kx = jax.random.split(key)
    params = init_params(kp, embedding_dim, intermediate_dim)
    x = jax.random.normal(kx, (batch, seq, embedding_dim), dtype=jnp.float32)

    out = feed_forward(params, x)
    out = jax.block_until_ready(out)
    assert out.shape == (batch, seq, embedding_dim)

    ref = jax.block_until_ready(feed_forward_reference(params, x))
    assert jnp.allclose(out, ref, atol=2e-2, rtol=2e-2), \
        f"max abs err {jnp.max(jnp.abs(out - ref))}"

    print("KERNEL_OK")
</pallas_src>

<mosaic_0001>
module attributes {stable_mosaic.version = 11 : i64} {
  func.func @_linear_relu_kernel(%arg0: i32, %arg1: i32, %arg2: i32, %arg3: memref<16x128xbf16, #tpu.memory_space<vmem>>, %arg4: memref<128x256xbf16, #tpu.memory_space<vmem>>, %arg5: memref<1x256xf32, #tpu.memory_space<vmem>>, %arg6: memref<16x256xbf16, #tpu.memory_space<vmem>>, %arg7: memref<16x256xf32, #tpu.memory_space<vmem>>) attributes {dimension_semantics = [#tpu.dimension_semantics<parallel>, #tpu.dimension_semantics<parallel>, #tpu.dimension_semantics<arbitrary>], iteration_bounds = array<i64: 1, 2, 1>, scalar_prefetch = 0 : i64, scratch_operands = 1 : i64, tpu.core_type = #tpu.core_type<tc>, window_params = [{transform_indices = @transform_0, window_bounds = array<i64: 16, 128>}, {transform_indices = @transform_1, window_bounds = array<i64: 128, 256>}, {transform_indices = @transform_2, window_bounds = array<i64: 1, 256>}, {transform_indices = @transform_3, window_bounds = array<i64: 16, 256>}]} {
    %c0_i32 = arith.constant 0 : i32
    %0 = arith.cmpi eq, %arg2, %c0_i32 : i32
    %1 = arith.extui %0 : i1 to i32
    %c0_i32_0 = arith.constant 0 : i32
    %2 = arith.cmpi ne, %1, %c0_i32_0 : i32
    scf.if %2 {
      %cst_10 = arith.constant 0.000000e+00 : f32
      %12 = vector.broadcast %cst_10 : f32 to vector<16x256xf32>
      %c0_11 = arith.constant 0 : index
      %c0_12 = arith.constant 0 : index
      %13 = vector.load %arg7[%c0_11, %c0_12] : memref<16x256xf32, #tpu.memory_space<vmem>>, vector<16x256xf32>
      tpu.vector_store %arg7[%c0_11, %c0_12], %12 {strides = array<i32>} : memref<16x256xf32, #tpu.memory_space<vmem>>, vector<16x256xf32>,
    } else {
    }
    %c0 = arith.constant 0 : index
    %c0_1 = arith.constant 0 : index
    %3 = vector.load %arg7[%c0, %c0_1] : memref<16x256xf32, #tpu.memory_space<vmem>>, vector<16x256xf32>
    %c0_2 = arith.constant 0 : index
    %c0_3 = arith.constant 0 : index
    %4 = vector.load %arg3[%c0_2, %c0_3] : memref<16x128xbf16, #tpu.memory_space<vmem>>, vector<16x128xbf16>
    %c0_4 = arith.constant 0 : index
    %c0_5 = arith.constant 0 : index
    %5 = vector.load %arg4[%c0_4, %c0_5] : memref<128x256xbf16, #tpu.memory_space<vmem>>, vector<128x256xbf16>
    %cst = arith.constant dense<0.000000e+00> : vector<16x256xf32>
    %6 = tpu.matmul %4, %5, %cst {dimension_numbers = #tpu.dot_dimension_numbers<[1], [0], [0], [1], [0, 0, 1, 1], [], []>} : vector<16x128xbf16>, vector<128x256xbf16>, vector<16x256xf32> -> vector<16x256xf32>
    %7 = arith.addf %3, %6 : vector<16x256xf32>
    %c0_6 = arith.constant 0 : index
    %c0_7 = arith.constant 0 : index
    %8 = vector.load %arg7[%c0_6, %c0_7] : memref<16x256xf32, #tpu.memory_space<vmem>>, vector<16x256xf32>
    tpu.vector_store %arg7[%c0_6, %c0_7], %7 {strides = array<i32>} : memref<16x256xf32, #tpu.memory_space<vmem>>, vector<16x256xf32>,
    %c0_i32_8 = arith.constant 0 : i32
    %9 = arith.cmpi eq, %arg2, %c0_i32_8 : i32
    %10 = arith.extui %9 : i1 to i32
    %c0_i32_9 = arith.constant 0 : i32
    %11 = arith.cmpi ne, %10, %c0_i32_9 : i32
    scf.if %11 {
      %c0_10 = arith.constant 0 : index
      %c0_11 = arith.constant 0 : index
      %12 = vector.load %arg7[%c0_10, %c0_11] : memref<16x256xf32, #tpu.memory_space<vmem>>, vector<16x256xf32>
      %c0_12 = arith.constant 0 : index
      %c0_13 = arith.constant 0 : index
      %13 = vector.load %arg5[%c0_12, %c0_13] : memref<1x256xf32, #tpu.memory_space<vmem>>, vector<1x256xf32>
      %14 = vector.broadcast %13 : vector<1x256xf32> to vector<16x256xf32>
      %15 = arith.addf %12, %14 : vector<16x256xf32>
      %cst_14 = arith.constant 0.000000e+00 : f32
      %16 = vector.broadcast %cst_14 : f32 to vector<16x256xf32>
      %17 = arith.maximumf %15, %16 : vector<16x256xf32>
      %18 = arith.truncf %17 : vector<16x256xf32> to vector<16x256xbf16>
      %c0_15 = arith.constant 0 : index
      %c0_16 = arith.constant 0 : index
      %19 = vector.load %arg6[%c0_15, %c0_16] : memref<16x256xbf16, #tpu.memory_space<vmem>>, vector<16x256xbf16>
      tpu.vector_store %arg6[%c0_15, %c0_16], %18 {strides = array<i32>} : memref<16x256xbf16, #tpu.memory_space<vmem>>, vector<16x256xbf16>,
    } else {
    }
    return
  }
  func.func @transform_0(%arg0: i32, %arg1: i32, %arg2: i32) -> (i32, i32) {
    %c0_i32 = arith.constant 0 : i32
    return %arg0, %arg2 : i32, i32
  }
  func.func @transform_1(%arg0: i32, %arg1: i32, %arg2: i32) -> (i32, i32) {
    %c0_i32 = arith.constant 0 : i32
    return %arg2, %arg1 : i32, i32
  }
  func.func @transform_2(%arg0: i32, %arg1: i32, %arg2: i32) -> (i32, i32) {
    %c0_i32 = arith.constant 0 : i32
    %c0_i32_0 = arith.constant 0 : i32
    return %c0_i32, %arg1 : i32, i32
  }
  func.func @transform_3(%arg0: i32, %arg1: i32, %arg2: i32) -> (i32, i32) {
    %c0_i32 = arith.constant 0 : i32
    return %arg0, %arg1 : i32, i32
  }
}

</mosaic_0001>

<bundles_post_ra>
// kernel: tpu_custom_call.1
= control target key start
LH: loop header
LB: loop body
LE: loop exit
PB: predicated region body
PF: predicated region fallthrough
CT: control target
= control target key end

     0   :  { %8 = vsyncpa [#allocation4], 0  ;;  %s1175_s0 = inlined_call_operand.hbm [shape: bf16[16,128], index: 0, kind: input, shape index: {}]   ;;  %s1176_s1 = inlined_call_operand.hbm [shape: bf16[128,512], index: 1, kind: input, shape index: {}]   ;;  %s1177_s2 = inlined_call_operand.vmem [shape: f32[1,512], index: 2, kind: input, shape index: {}]   ;;  %s1178_s3 = inlined_call_operand.hbm [shape: bf16[16,512], index: 3, kind: output, shape index: {}]  }
   0x1   :  { %9 = vsyncpa [#allocation7], 0 }
   0x2   :  { %11 = vsyncpa [#allocation7 + $0x1], 0 }
   0x3   :  { %12 = vsyncpa [#allocation5], 0 }
   0x4   :  { %14 = vsyncpa [#allocation5 + $0x1], 0  ;;  %s932_s12 = smov 0   ;;  %s934_s13 = smov 0  }
   0x5   :  { %s936_s14 = smov 0   ;;  %s938_s15 = smov 0  }
   0x6   :  { %s940_s16 = smov 0   ;;  %s942_s17 = smov 0  }
   0x7 LB: > { %s606_s18 = sadd.s32 4294967295, %s898_s17   ;;  %s607_s19 = sadd.s32 4294967294, %s898_s17   ;;  %s898_s17 = sphi %s942_s17, %s20_s17   ;;  %s894_s16 = sphi %s940_s16, %s1204_s16   ;;  %s890_s15 = sphi %s938_s15, %s1203_s15   ;;  %s886_s14 = sphi %s936_s14, %s1202_s14   ;;  %s882_s13 = sphi %s934_s13, %s1201_s13   ;;  %s878_s12 = sphi %s932_s12, %s1200_s12  }
   0x8   : > { %p83_p0 = scmp.ne.s32.totalorder %s886_s14, %s882_s13  ;;  %p84_p1 = scmp.eq.s32.totalorder %s898_s17, 0 }
   0x9   : > { %p89_p2 = scmp.ne.s32.totalorder %s882_s13, %s878_s12  ;;  %p969_p3 = scmp.eq.s32.totalorder %s606_s18, 0 }
   0xa   : > { %p973_p4 = por %p84_p1, %p83_p0  ;;  %p141_p5 = scmp.eq.s32.totalorder %s606_s18, 1 }
   0xb   : > { %s1185_s20 = scalar_select %p969_p3, 1, 0 }
   0xc   : > { %p979_p6 = por %p969_p3, %p89_p2  ;;  %p147_p7 = scmp.eq.s32.totalorder %s607_s19, 1 }
   0xd   : > { %p983_p8 = por %p141_p5, %p83_p0  ;;  %p608_p9 = scmp.ge.s32.totalorder %s898_s17, 1 }
   0xe   : > { %s1187_s22 = scalar_select %p979_p6, 1, 0 }
   0xf   : > { %s1188_s23 = scalar_select %p983_p8, 1, 0 }
  0x10   : > { %p988_p10 = por %p147_p7, %p89_p2  ;;  %p154_p11 = scmp.lt.s32.totalorder %s898_s17, 3 }
  0x11   : > { %s900_s26 = smov [#allocation3]   ;;  %p668_p1 = scmp.lt.s32.totalorder %s898_s17, 2 }
  0x12   : > { %s1189_s24 = scalar_select %p988_p10, 1, 0 }
  0x13   : > { %p993_p12 = pnand %p608_p9, %p154_p11  ;;  %s170_s27 = sshll.u32 %s900_s26, 4  ;;  %s997_s27 = int_to_ptr.vmem [resolvable:$true] %s170_s27 }
  0x14   : > { %p1011_p2 = pnand %p668_p1, %p973_p4  ;;  %s35_s30 = sadd.s32 1, %s894_s16 }
  0x15   : > { %s1190_s25 = scalar_select %p993_p12, 1, 0 }
  0x16   : > { %p655_p13 = pneg %p993_p12  ;;  %s754_s6 = scalar_lea.hbm %s1175_s0, 128 }
  0x17   : > { %s1192_s29 = scalar_select %p1011_p2, 1, 0 }
  0x18   : > { %p1005_p5 = pnand %p655_p13, %p969_p3  ;;  %p755_p7 = scmp.ne.s32.totalorder %s1175_s0, %s754_s6 }
  0x19   : > { %p761_p4 = scmp.lt.u32.totalorder %s754_s6, %s1175_s0 }
  0x1a   : > { %p756_p9 = pneg %p1005_p5 }
  0x1c   : > { %p757_p11 = pnand %p756_p9, %p755_p7 }
  0x1e   : > { %p758_p13 = pneg %p757_p11 }
  0x20   : > { %p763_p1 = pnand %p761_p4, %p758_p13 }
  0x22   : > { %766 = shalt.err (!%p763_p1)
}
  0x23   : > { %s767_s11 = scalar_lea.vmem %s997_s27, 128  ;;  %p775_p6 = scmp.lt.s32.totalorder %s997_s27, %s997_s27 }
  0x24   : > { %p768_p0 = scmp.ne.s32.totalorder %s997_s27, %s767_s11  ;;  %p776_p3 = scmp.lt.s32.totalorder %s767_s11, %s767_s11 }
  0x26   : > { %p770_p10 = pnand %p768_p0, %p756_p9  ;;  %p777_p12 = por %p776_p3, %p775_p6 }
  0x28   : > { %p771_p8 = pneg %p770_p10 }
  0x2a   : > { %p778_p2 = pnand %p777_p12, %p771_p8 }
  0x2c   : > { %781 = shalt.err (!%p778_p2)
}
  0x2d   : > { %s901_s18 = smov 64   ;;  %s902_s19 = smov 4  }
  0x2e   : > { %658 = dma.hbm_to_vmem [thread:$0]  (!%p1005_p5), %s1175_s0, 128, %s997_s27, [#allocation4], %s901_s18, %s901_s18, %s902_s19  }
  0x2f   : > { %p37_p10 = scmp.ge.s32.totalorder %s35_s30, 2  ;;  %s76_s4 = sadd.s32 1, %s886_s14 }
  0x30   : > { %s184_s5 = sand.u32 1, %s886_s14   ;;  %s643_s8 = sshll.u32 %s894_s16, 7 }
  0x31   : > { %s1206_s30 = smov (%p37_p10, %s35_s30), 0  ;;  %s611_s6 = sshll.u32 %s184_s5, 7 }
  0x32   : > { %s72_s7 = ssub.s32 %s894_s16, %s1206_s30  ;;  %s1047_s28 = scalar_lea.hbm %s1176_s1, %s643_s8 }
  0x33   : > { %p74_p3 = scmp.eq.s32.totalorder %s72_s7, 0  ;;  %s188_s27 = scalar_lea.vmem [#allocation6], %s611_s6 }
  0x34   : > { %s198_s11 = sshll.u32 %s188_s27, 4  ;;  %s1054_s19 = scalar_lea.sflag [#allocation7], %s184_s5  ;;  %s1052_s11 = int_to_ptr.vmem [resolvable:$true] %s198_s11 }
  0x35   : > { %s1050_s18 = scalar_select %p74_p3, %s886_s14, %s76_s4  }
  0x36   : > { %s782_s21 = scalar_lea.hbm %s1047_s28, 2048  ;;  %p1193_p8 = scmp.ne.s32.totalorder %s1192_s29, 0 }
  0x37   : > { %p783_p6 = scmp.ne.s32.totalorder %s1047_s28, %s782_s21  ;;  %s787_s8 = scalar_lea.hbm %s1176_s1, 4096 }
  0x38   : > { %p784_p12 = pneg %p1193_p8  ;;  %p788_p2 = scmp.lt.u32.totalorder %s1047_s28, %s1176_s1 }
  0x39   : > { %p789_p7 = scmp.lt.u32.totalorder %s787_s8, %s782_s21  ;;  %p791_p11 = scmp.lt.u32.totalorder %s782_s21, %s1047_s28 }
  0x3a   : > { %p785_p0 = pnand %p784_p12, %p783_p6 }
  0x3b   : > { %p790_p9 = por %p789_p7, %p788_p2 }
  0x3c   : > { %p786_p5 = pneg %p785_p0 }
  0x3d   : > { %p792_p13 = por %p791_p11, %p790_p9 }
  0x3f   : > { %p793_p4 = pnand %p792_p13, %p786_p5 }
  0x41   : > { %796 = shalt.err (!%p793_p4)
}
  0x42   : > { %s797_s4 = scalar_lea.vmem %s1052_s11, 2048  ;;  %s903_s5 = smov [#allocation6]  }
  0x43   : > { %p798_p1 = scmp.ne.s32.totalorder %s1052_s11, %s797_s4  ;;  %s802_s10 = sshll.u32 %s903_s5, 4  ;;  %s803_s10 = int_to_ptr.vmem [resolvable:$false] %s802_s10 }
  0x44   : > { %s804_s27 = scalar_lea.vmem %s803_s10, 4096  ;;  %p805_p6 = scmp.lt.s32.totalorder %s1052_s11, %s803_s10 }
  0x45   : > { %p800_p10 = pnand %p798_p1, %p784_p12  ;;  %p806_p0 = scmp.lt.s32.totalorder %s804_s27, %s797_s4 }
  0x47   : > { %p801_p3 = pneg %p800_p10  ;;  %p807_p2 = por %p806_p0, %p805_p6 }
  0x49   : > { %p808_p7 = pnand %p807_p2, %p801_p3 }
  0x4b   : > { %811 = shalt.err (!%p808_p7)
}
  0x4c   : > { %s904_s21 = smov 256   ;;  %s905_s26 = smov 128  }
  0x4d   : > { %s906_s7 = smov 8   ;;  %p1194_p12 = scmp.ne.s32.totalorder %s1190_s25, 0 }
  0x4e   : > { %662 = dma.hbm_to_vmem [thread:$0]  (!%p1193_p8), %s1047_s28, 2048, %s1052_s11, %s1054_s19, %s904_s21, %s905_s26, %s906_s7  }
  0x4f   : > { %218 = sbr.rel (%p1194_p12) target bundleno = 361 (0x169), region = 32  ;;  %p1195_p5 = scmp.ne.s32.totalorder (!%p1194_p12), %s1185_s20, 0 }
  0x56   : > { %865 = dma.done.wait (%p1195_p5), [#allocation4], 128  }
  0x57   : > { %867 = vsyncadd (%p1195_p5), [#allocation4], 4294967168  ;;  %s1089_s8 = sand.u32 1, %s882_s13   ;;  %p1196_p8 = scmp.ne.s32.totalorder %s1187_s22, 0 }
  0x58   : > { %s616_s6 = sshll.u32 %s1089_s8, 7  ;;  %s225_s9 = scalar_lea.sflag [#allocation7], %s1089_s8 }
  0x59   : > { %s1093_s4 = scalar_lea.vmem [#allocation6], %s616_s6 }
  0x5a   : > { %869 = dma.done.wait (%p1196_p8), %s225_s9, 2048  }
  0x5b   : > { %871 = vsyncadd (%p1196_p8), %s225_s9, 4294965248  ;;  %v907_v0 = vmov 0   ;;  %v729_v1 = vld [vmem:[%s1093_s4 + $0x4] ss:$8 sps:$4 sm:$0xff]   ;;  %v731_v2 = vld [vmem:[%s1093_s4] ss:$8 sps:$4 sm:$0xff]   ;;  %v442_v18 = vlaneseq }
  0x5c   : > { %414 = vmatprep.mubr.bf16.mxu0 %v907_v0  ;;  %382 = vmatprep.subr.bf16.mxu0 %v729_v1  ;;  %v732_v3 = vld [vmem:[%s1093_s4 + $0x14] ss:$8 sps:$4 sm:$0xff]   ;;  %v734_v4 = vld [vmem:[%s1093_s4 + $0x10] ss:$8 sps:$4 sm:$0xff]   ;;  %v735_v5 = vld [vmem:[%s1093_s4 + $0x24] ss:$8 sps:$4 sm:$0xff]  }
  0x5d   : > { %383 = vmatpush1.bf16.msra.mxu0 %v731_v2  ;;  %v737_v6 = vld [vmem:[%s1093_s4 + $0x20] ss:$8 sps:$4 sm:$0xff]   ;;  %v738_v7 = vld [vmem:[%s1093_s4 + $0x34] ss:$8 sps:$4 sm:$0xff]   ;;  %v740_v8 = vld [vmem:[%s1093_s4 + $0x30] ss:$8 sps:$4 sm:$0xff]  }
  0x5e   : > { %384 = vmatprep.subr.bf16.mxu0 %v732_v3  ;;  %v741_v9 = vld [vmem:[%s1093_s4 + $0x44] ss:$8 sps:$4 sm:$0xff]   ;;  %v743_v10 = vld [vmem:[%s1093_s4 + $0x40] ss:$8 sps:$4 sm:$0xff]   ;;  %v744_v11 = vld [vmem:[%s1093_s4 + $0x54] ss:$8 sps:$4 sm:$0xff]  }
  0x5f   : > { %v746_v12 = vld [vmem:[%s1093_s4 + $0x50] ss:$8 sps:$4 sm:$0xff]   ;;  %v747_v13 = vld [vmem:[%s1093_s4 + $0x64] ss:$8 sps:$4 sm:$0xff]   ;;  %v749_v14 = vld [vmem:[%s1093_s4 + $0x60] ss:$8 sps:$4 sm:$0xff]  }
  0x60   : > { %v750_v15 = vld [vmem:[%s1093_s4 + $0x74] ss:$8 sps:$4 sm:$0xff]   ;;  %v752_v16 = vld [vmem:[%s1093_s4 + $0x70] ss:$8 sps:$4 sm:$0xff]   ;;  %s618_s20 = sshll.u32 %s890_s15, 1  ;;  %v443_v19 = vshrl.u32 %v442_v18, 7 }
  0x61   : > { %385 = vmatpush1.bf16.msra.mxu0 %v734_v4  ;;  %v753_v17 = vld [vmem:[#allocation3] sm:$0xff]   ;;  %p259_p9 = scmp.lt.s32.totalorder %s618_s20, 3  ;;  %s617_s28 = sshll.u32 %s1089_s8, 4 }
  0x62   : > { %386 = vmatprep.subr.bf16.mxu0 %v735_v5  ;;  %v444_v20 = vsub.s32 0, %v443_v19  ;;  %v448_v22 = vsub.s32 1, %v443_v19  ;;  %s254_s11 = scalar_lea.vmem [#allocation8], %s617_s28  ;;  %s646_s5 = sshll.u32 %s890_s15, 7 }
  0x63   : > { %s1208_s20 = smov (!%p259_p9, %s618_s20), 3  ;;  %s491_s19 = sshll.u32 %s254_s11, 4  ;;  %s1121_s19 = int_to_ptr.vmem [resolvable:$true] %s491_s19 }
  0x64   : > { %s261_s29 = scalar_lea.vmem %s1177_s2, %s1208_s20  ;;  %s1126_s21 = scalar_lea.hbm %s1178_s3, %s646_s5 }
  0x65   : > { %387 = vmatpush1.bf16.msra.mxu0 %v737_v6  ;;  %v440_v21 = vld [vmem:[%s261_s29] sm:$0x3]  ;;  %s475_s26 = scalar_lea.sflag [#allocation5], %s1089_s8  ;;  %s812_s7 = scalar_lea.vmem %s1121_s19, 256 }
  0x66   : > { %388 = vmatprep.subr.bf16.mxu0 %v738_v7  ;;  %v445_v23 = vrot.slane %v440_v21, %v444_v20  ;;  %v449_v24 = vrot.slane %v440_v21, %v448_v22  ;;  %p813_p11 = scmp.ne.s32.totalorder %s1121_s19, %s812_s7  ;;  %p1197_p13 = scmp.ne.s32.totalorder %s1188_s23, 0 }
  0x67   : > { %s908_s15 = smov [#allocation8]  }
  0x68   : > { %p814_p4 = pnand %p813_p11, %p1197_p13  ;;  %s816_s6 = sshll.u32 %s908_s15, 4  ;;  %s817_s6 = int_to_ptr.vmem [resolvable:$false] %s816_s6 }
  0x69   : > { %389 = vmatpush1.bf16.msra.mxu0 %v740_v8  ;;  %s818_s9 = scalar_lea.vmem %s817_s6, 512  ;;  %p819_p10 = scmp.lt.s32.totalorder %s1121_s19, %s817_s6 }
  0x6a   : > { %390 = vmatprep.subr.bf16.mxu0 %v741_v9  ;;  %p815_p1 = pneg %p814_p4  ;;  %p820_p3 = scmp.lt.s32.totalorder %s818_s9, %s812_s7 }
  0x6c   : > { %p821_p6 = por %p820_p3, %p819_p10 }
  0x6d   : > { %391 = vmatpush1.bf16.msra.mxu0 %v743_v10 }
  0x6e   : > { %392 = vmatprep.subr.bf16.mxu0 %v744_v11  ;;  %p822_p0 = pnand %p821_p6, %p815_p1 }
  0x71   : > { %393 = vmatpush1.bf16.msra.mxu0 %v746_v12 }
  0x72   : > { %394 = vmatprep.subr.bf16.mxu0 %v747_v13 }
  0x75   : > { %395 = vmatpush1.bf16.msra.mxu0 %v749_v14 }
  0x76   : > { %396 = vmatprep.subr.bf16.mxu0 %v750_v15 }
  0x79   : > { %397 = vmatpush1.bf16.msra.mxu0 %v752_v16 }
  0x7c   : > { %415 = vmatmul.mubr.bf16.vlgmr.msra.gmra.mrb[0].mxu0 %v753_v17 }
 0x14f   : > { %v416_v25 = vpop.f32.mrb[0].mxu0 }
 0x150   : > { %v452_v26 = vadd.f32 %v445_v23, %v416_v25  ;;  %v418_v27 = vpop.f32.mrb[1].mxu0 }
 0x151   : > { %v453_v28 = vadd.f32 %v449_v24, %v418_v27  ;;  %v420_v29 = vpop.f32.mrb[2].mxu0 }
 0x152   : > { %v456_v30 = vmax.f32 %v452_v26, 0.0  ;;  %v454_v31 = vadd.f32 %v445_v23, %v420_v29  ;;  %v422_v32 = vpop.f32.mrb[3].mxu0 }
 0x153   : > { %v457_v33 = vmax.f32 %v453_v28, 0.0  ;;  %v455_v34 = vadd.f32 %v449_v24, %v422_v32 }
 0x154   : > { %v458_v35 = vmax.f32 %v454_v31, 0.0 }
 0x155   : > { %v644_v36 = vpack.c.bf16 %v457_v33, %v456_v30  ;;  %v459_v37 = vmax.f32 %v455_v34, 0.0 }
 0x157   : > { %472 = vst [vmem:[%s254_s11] sm:$0xff] %v644_v36  ;;  %v645_v38 = vpack.c.bf16 %v459_v37, %v458_v35 }
 0x159   : > { %473 = vst [vmem:[%s254_s11 + $0x8] sm:$0xff] %v645_v38 }
 0x15a   : > { %825 = shalt.err (!%p822_p0)
}
 0x15b   : > { %s826_s4 = scalar_lea.hbm %s1126_s21, 256  ;;  %s830_s25 = scalar_lea.hbm %s1178_s3, 512 }
 0x15c   : > { %p827_p2 = scmp.ne.s32.totalorder %s1126_s21, %s826_s4  ;;  %p831_p5 = scmp.lt.u32.totalorder %s1126_s21, %s1178_s3 }
 0x15d   : > { %p832_p8 = scmp.lt.u32.totalorder %s830_s25, %s826_s4  ;;  %p834_p11 = scmp.lt.u32.totalorder %s826_s4, %s1126_s21 }
 0x15e   : > { %p828_p7 = pnand %p827_p2, %p1197_p13 }
 0x15f   : > { %p833_p9 = por %p832_p8, %p831_p5 }
 0x160   : > { %p829_p12 = pneg %p828_p7 }
 0x161   : > { %p835_p4 = por %p834_p11, %p833_p9 }
 0x163   : > { %p836_p1 = pnand %p835_p4, %p829_p12 }
 0x165   : > { %839 = shalt.err (!%p836_p1)
}
 0x166   : > { %s909_s11 = smov 128   ;;  %s910_s5 = smov 256  }
 0x167   : > { %s911_s10 = smov 8  }
 0x168   : > { %653 = dma.vmem_to_hbm [thread:$0]  (%p1197_p13), %s1121_s19, 256, %s1126_s21, %s475_s26, %s909_s11, %s910_s5, %s911_s10  }
 0x169 PF: > { %s506_s27 = sand.u32 1, %s878_s12   ;;  %p1198_p10 = scmp.ne.s32.totalorder %s1189_s24, 0 }
 0x16a   : > { %p1199_p3 = scmp.ge.s32.totalorder %s898_s17, 2  ;;  %s507_s7 = scalar_lea.sflag [#allocation5], %s506_s27 }
 0x16c   : > { %p664_p6 = pnand %p1199_p3, %p1198_p10 }
 0x16e   : > { %873 = dma.done.wait (!%p664_p6), %s507_s7, 256  }
 0x16f   : > { %875 = vsyncadd (!%p664_p6), %s507_s7, 4294967040  ;;  %s20_s17 = sadd.s32 1, %s898_s17   ;;  %s1200_s12 = smov %s882_s13 }
 0x170   : > { %p17_p0 = scmp.ge.s32.totalorder %s20_s17, 4   ;;  %s1201_s13 = smov %s886_s14 }
 0x171   : > { %s1202_s14 = smov %s1050_s18  ;;  %s1203_s15 = smov %s894_s16 }
 0x172   : > { %s1204_s16 = smov %s1206_s30  ;;  %19 = sbr.rel (!%p17_p0) target bundleno = 7 (0x7), region = 94 }
 0x179   :  { %512 = vsyncpa [#allocation4], 1 }
 0x17a   :  { %514 = vsyncpa [#allocation4 + $0x1], 1 }
 0x17b   :  { %515 = vsyncpa [#allocation7], 1 }
 0x17c   :  { %517 = vsyncpa [#allocation7 + $0x1], 1 }
 0x17d   :  { %518 = vsyncpa [#allocation5], 1 }
 0x17e   :  { %520 = vsyncpa [#allocation5 + $0x1], 1 }

</bundles_post_ra>
